<compile_context>
chip_gen: v6e
topology: v6e:2x2x1
jax: 0.10.0
libtpu: 0.0.40
codegen_flags: <defaults>
</compile_context>

<pallas_src>
import math

import jax
import jax.numpy as jnp
from jax.experimental import pallas as pl
from jax.experimental.pallas import tpu as pltpu


# ----------------------------------------------------------------------------
# Fused Pallas kernel: all stochastic layers (MLP + clamp + reparam sample)
# ----------------------------------------------------------------------------
def _fused_kernel(x_ref, w1c_ref, w1z_ref, b1_ref, w2_ref, b2_ref,
                  w3_ref, b3_ref, w4_ref, b4_ref, eps_ref, out_ref):
    num_layers = w2_ref.shape[0]
    hidden = w2_ref.shape[-1]
    z_dim = eps_ref.shape[-1]

    x_bf = x_ref[...].astype(jnp.bfloat16)

    # Hoisted loop-invariant part of every layer's first Linear:
    # one wide MXU dot -> (TILE_N, L*hidden), sliced per layer below.
    ctx_all = jnp.dot(x_bf, w1c_ref[...], preferred_element_type=jnp.float32)

    samples_bf = None
    for layer in range(num_layers):  # static unroll (L known at trace time)
        pre = ctx_all[:, layer * hidden:(layer + 1) * hidden] + b1_ref[layer]
        if layer > 0:
            pre = pre + jnp.dot(samples_bf, w1z_ref[layer - 1],
                                preferred_element_type=jnp.float32)
        h = jnp.maximum(pre, 0.0).astype(jnp.bfloat16)
        h = jnp.maximum(
            jnp.dot(h, w2_ref[layer], preferred_element_type=jnp.float32)
            + b2_ref[layer], 0.0).astype(jnp.bfloat16)
        h = jnp.maximum(
            jnp.dot(h, w3_ref[layer], preferred_element_type=jnp.float32)
            + b3_ref[layer], 0.0).astype(jnp.bfloat16)

        # Single head dot; means / logvars sliced from the in-register result.
        head = (jnp.dot(h, w4_ref[layer], preferred_element_type=jnp.float32)
                + b4_ref[layer])
        means = head[:, :z_dim]
        logvars = jnp.clip(head[:, z_dim:], -10.0, 10.0)   # torch.clamp(-10, 10)
        samples = means + jnp.exp(0.5 * logvars) * eps_ref[layer]

        # Coalesced stores: clamp only the logvar lanes (>= z_dim) in-register,
        # then one store for [means|logvars] and one store for samples.
        lane = jax.lax.broadcasted_iota(jnp.int32, head.shape, 1)
        ml = jnp.where(lane >= z_dim, jnp.clip(head, -10.0, 10.0), head)
        out_ref[layer, :, 0:2 * z_dim] = ml
        out_ref[layer, :, 2 * z_dim:3 * z_dim] = samples

        samples_bf = samples.astype(jnp.bfloat16)  # feed the next layer's w1_z dot


def _fused_call(x, params, eps, z_dim, tile_n=512):
    n, ctx_h = x.shape
    w1c, w1z, b1, w2, b2, w3, b3, w4, b4 = params
    num_layers = w2.shape[0]

    tile_n = min(tile_n, n)
    if n % tile_n != 0 or tile_n % 8 != 0:
        tile_n = n                       # toy / ragged shapes: single tile
    grid = (n // tile_n,)

    def full_spec(a):
        return pl.BlockSpec(a.shape, lambda i, _nd=a.ndim: (0,) * _nd)

    return pl.pallas_call(
        _fused_kernel,
        out_shape=jax.ShapeDtypeStruct((num_layers, n, 3 * z_dim), jnp.float32),
        grid=grid,
        in_specs=[
            pl.BlockSpec((tile_n, ctx_h), lambda i: (i, 0)),                 # x
            full_spec(w1c), full_spec(w1z), full_spec(b1),
            full_spec(w2), full_spec(b2),
            full_spec(w3), full_spec(b3),
            full_spec(w4), full_spec(b4),
            pl.BlockSpec((num_layers, tile_n, z_dim), lambda i: (0, i, 0)),  # eps
        ],
        out_specs=pl.BlockSpec((num_layers, tile_n, 3 * z_dim),
                               lambda i: (0, i, 0)),
        compiler_params=pltpu.CompilerParams(
            dimension_semantics=("parallel",)),
    )(x, w1c, w1z, b1, w2, b2, w3, b3, w4, b4, eps)


# ----------------------------------------------------------------------------
# Parameter construction (deterministic, PyTorch-Linear-style uniform init),
# stacked over layers; first-layer weight split into context vs samples rows.
# ----------------------------------------------------------------------------
def _linear_params(key, fan_in, fan_out):
    bound = 1.0 / math.sqrt(fan_in)
    kw, kb = jax.random.split(key)
    w = jax.random.uniform(kw, (fan_in, fan_out), jnp.float32, -bound, bound)
    b = jax.random.uniform(kb, (1, fan_out), jnp.float32, -bound, bound)
    return w, b


def build_params(key, num_stochastic_layers, z_dim, context_dim, h_dim, hidden=128):
    ctx_h = context_dim + h_dim
    w1c_l, w1z_l, b1_l = [], [], []
    w2_l, b2_l, w3_l, b3_l, w4_l, b4_l = [], [], [], [], [], []
    for i in range(num_stochastic_layers):
        keys = jax.random.split(jax.random.fold_in(key, i), 4)
        fan_in = ctx_h if i == 0 else ctx_h + z_dim
        w1, b1 = _linear_params(keys[0], fan_in, hidden)
        w1c_l.append(w1[:ctx_h])                 # rows for [context|data]
        if i > 0:
            w1z_l.append(w1[ctx_h:])             # rows for previous samples
        b1_l.append(b1)
        w2, b2 = _linear_params(keys[1], hidden, hidden)
        w3, b3 = _linear_params(keys[2], hidden, hidden)
        w4, b4 = _linear_params(keys[3], hidden, 2 * z_dim)
        w2_l.append(w2); b2_l.append(b2)
        w3_l.append(w3); b3_l.append(b3)
        w4_l.append(w4); b4_l.append(b4)

    # Wide layout (ctx_h, L*hidden) so ONE dot covers every layer's ctx part.
    w1c_wide = jnp.concatenate(w1c_l, axis=1)
    if num_stochastic_layers > 1:
        w1z = jnp.stack(w1z_l)                   # (L-1, z_dim, hidden)
    else:
        w1z = jnp.zeros((1, z_dim, hidden), jnp.float32)  # unused dummy

    bf = jnp.bfloat16  # MXU-native operand dtype; biases stay f32 (added post-acc)
    return (w1c_wide.astype(bf), w1z.astype(bf), jnp.stack(b1_l),
            jnp.stack(w2_l).astype(bf), jnp.stack(b2_l),
            jnp.stack(w3_l).astype(bf), jnp.stack(b3_l),
            jnp.stack(w4_l).astype(bf), jnp.stack(b4_l))


# ----------------------------------------------------------------------------
# Forward pass (mirrors InferenceNetwork.forward for experiment='synthetic')
# ----------------------------------------------------------------------------
def inference_network_forward(input_dict, params, eps, z_dim, h_dim):
    context_expanded = input_dict['samples_context_expanded']   # (N, context_dim)
    datasets = input_dict['train_data_encoded']                 # (B, P, h_dim)
    datasets_raveled = datasets.reshape(-1, h_dim)              # (N, h_dim)

    x = jnp.concatenate([context_expanded, datasets_raveled], axis=1)  # once
    packed = _fused_call(x, params, eps, z_dim)                 # (L, N, 3*z_dim)

    outputs = {'means_latent_z': [], 'logvars_latent_z': [], 'samples_latent_z': []}
    for layer in range(packed.shape[0]):
        outputs['means_latent_z'].append(packed[layer, :, :z_dim])
        outputs['logvars_latent_z'].append(packed[layer, :, z_dim:2 * z_dim])
        outputs['samples_latent_z'].append(packed[layer, :, 2 * z_dim:])
    return outputs


# ----------------------------------------------------------------------------
# Pure-JAX reference (same bf16-operand / f32-accumulate recipe, for validation)
# ----------------------------------------------------------------------------
def _reference_forward(x, params, eps, z_dim):
    w1c, w1z, b1, w2, b2, w3, b3, w4, b4 = params
    num_layers = w2.shape[0]
    hidden = w2.shape[-1]
    bf = jnp.bfloat16
    x_bf = x.astype(bf)
    outs = []
    samples = None
    for l in range(num_layers):
        pre = jnp.dot(x_bf, w1c[:, l * hidden:(l + 1) * hidden],
                      preferred_element_type=jnp.float32) + b1[l]
        if l > 0:
            pre = pre + jnp.dot(samples.astype(bf), w1z[l - 1],
                                preferred_element_type=jnp.float32)
        h = jax.nn.relu(pre).astype(bf)
        h = jax.nn.relu(jnp.dot(h, w2[l], preferred_element_type=jnp.float32)
                        + b2[l]).astype(bf)
        h = jax.nn.relu(jnp.dot(h, w3[l], preferred_element_type=jnp.float32)
                        + b3[l]).astype(bf)
        head = jnp.dot(h, w4[l], preferred_element_type=jnp.float32) + b4[l]
        means = head[:, :z_dim]
        logvars = jnp.clip(head[:, z_dim:], -10.0, 10.0)
        samples = means + jnp.exp(0.5 * logvars) * eps[l]
        outs.append((means, logvars, samples))
    return outs


# ----------------------------------------------------------------------------
# Main
# ----------------------------------------------------------------------------
if __name__ == "__main__":
    num_stochastic_layers = 2
    z_dim = 16
    context_dim = 32
    h_dim = 32
    batch = 2
    num_datapoints = 8
    N = batch * num_datapoints

    root = jax.random.PRNGKey(0)
    k_ctx, k_data, k_param, k_eps = jax.random.split(root, 4)

    input_dict = {
        'samples_context_expanded':
            jax.random.normal(k_ctx, (N, context_dim), jnp.float32),
        'train_data_encoded':
            jax.random.normal(k_data, (batch, num_datapoints, h_dim), jnp.float32),
    }

    params = build_params(k_param, num_stochastic_layers, z_dim, context_dim, h_dim)

    # Deterministic standard-normal noise for the reparameterization trick,
    # packed over layers: (L, N, z_dim).
    eps = jax.random.normal(k_eps, (num_stochastic_layers, N, z_dim), jnp.float32)

    outputs = inference_network_forward(input_dict, params, eps, z_dim, h_dim)
    jax.block_until_ready(outputs)

    # Sanity checks: shapes, finiteness, clamp bounds.
    for key in ('means_latent_z', 'logvars_latent_z', 'samples_latent_z'):
        assert len(outputs[key]) == num_stochastic_layers
        for arr in outputs[key]:
            assert arr.shape == (N, z_dim)
            assert bool(jnp.all(jnp.isfinite(arr)))
    for lv in outputs['logvars_latent_z']:
        assert bool(jnp.all(lv >= -10.0)) and bool(jnp.all(lv <= 10.0))

    # Numerical check against the pure-JAX reference (same bf16 dot recipe).
    x_full = jnp.concatenate(
        [input_dict['samples_context_expanded'],
         input_dict['train_data_encoded'].reshape(-1, h_dim)], axis=1)
    ref = _reference_forward(x_full, params, eps, z_dim)
    for l in range(num_stochastic_layers):
        rm, rv, rs = ref[l]
        assert bool(jnp.allclose(outputs['means_latent_z'][l], rm, atol=2e-2, rtol=2e-2))
        assert bool(jnp.allclose(outputs['logvars_latent_z'][l], rv, atol=2e-2, rtol=2e-2))
        assert bool(jnp.allclose(outputs['samples_latent_z'][l], rs, atol=2e-2, rtol=2e-2))

    print("KERNEL_OK")
</pallas_src>

<mosaic_0001>
module attributes {stable_mosaic.version = 11 : i64} {
  func.func @_fused_kernel(%arg0: i32, %arg1: memref<16x64xf32, #tpu.memory_space<vmem>>, %arg2: memref<64x256xbf16, #tpu.memory_space<vmem>>, %arg3: memref<1x16x128xbf16, #tpu.memory_space<vmem>>, %arg4: memref<2x1x128xf32, #tpu.memory_space<vmem>>, %arg5: memref<2x128x128xbf16, #tpu.memory_space<vmem>>, %arg6: memref<2x1x128xf32, #tpu.memory_space<vmem>>, %arg7: memref<2x128x128xbf16, #tpu.memory_space<vmem>>, %arg8: memref<2x1x128xf32, #tpu.memory_space<vmem>>, %arg9: memref<2x128x32xbf16, #tpu.memory_space<vmem>>, %arg10: memref<2x1x32xf32, #tpu.memory_space<vmem>>, %arg11: memref<2x16x16xf32, #tpu.memory_space<vmem>>, %arg12: memref<2x16x48xf32, #tpu.memory_space<vmem>>) attributes {dimension_semantics = [#tpu.dimension_semantics<parallel>], iteration_bounds = array<i64: 1>, scalar_prefetch = 0 : i64, scratch_operands = 0 : i64, tpu.core_type = #tpu.core_type<tc>, window_params = [{transform_indices = @transform_0, window_bounds = array<i64: 16, 64>}, {pipeline_mode = #tpu.pipeline_mode<synchronous>, transform_indices = @transform_1, window_bounds = array<i64: 64, 256>}, {pipeline_mode = #tpu.pipeline_mode<synchronous>, transform_indices = @transform_2, window_bounds = array<i64: 1, 16, 128>}, {pipeline_mode = #tpu.pipeline_mode<synchronous>, transform_indices = @transform_3, window_bounds = array<i64: 2, 1, 128>}, {pipeline_mode = #tpu.pipeline_mode<synchronous>, transform_indices = @transform_4, window_bounds = array<i64: 2, 128, 128>}, {pipeline_mode = #tpu.pipeline_mode<synchronous>, transform_indices = @transform_5, window_bounds = array<i64: 2, 1, 128>}, {pipeline_mode = #tpu.pipeline_mode<synchronous>, transform_indices = @transform_6, window_bounds = array<i64: 2, 128, 128>}, {pipeline_mode = #tpu.pipeline_mode<synchronous>, transform_indices = @transform_7, window_bounds = array<i64: 2, 1, 128>}, {pipeline_mode = #tpu.pipeline_mode<synchronous>, transform_indices = @transform_8, window_bounds = array<i64: 2, 128, 32>}, {pipeline_mode = #tpu.pipeline_mode<synchronous>, transform_indices = @transform_9, window_bounds = array<i64: 2, 1, 32>}, {transform_indices = @transform_10, window_bounds = array<i64: 2, 16, 16>}, {transform_indices = @transform_11, window_bounds = array<i64: 2, 16, 48>}]} {
    %c0 = arith.constant 0 : index
    %c0_0 = arith.constant 0 : index
    %0 = vector.load %arg1[%c0, %c0_0] : memref<16x64xf32, #tpu.memory_space<vmem>>, vector<16x64xf32>
    %1 = arith.truncf %0 : vector<16x64xf32> to vector<16x64xbf16>
    %c0_1 = arith.constant 0 : index
    %c0_2 = arith.constant 0 : index
    %2 = vector.load %arg2[%c0_1, %c0_2] : memref<64x256xbf16, #tpu.memory_space<vmem>>, vector<64x256xbf16>
    %cst = arith.constant dense<0.000000e+00> : vector<16x256xf32>
    %3 = tpu.matmul %1, %2, %cst {dimension_numbers = #tpu.dot_dimension_numbers<[1], [0], [0], [1], [0, 0, 1, 1], [], []>} : vector<16x64xbf16>, vector<64x256xbf16>, vector<16x256xf32> -> vector<16x256xf32>
    %4 = vector.extract_strided_slice %3 {offsets = [0, 0], sizes = [16, 128], strides = [1, 1]} : vector<16x256xf32> to vector<16x128xf32>
    %c0_3 = arith.constant 0 : index
    %c0_4 = arith.constant 0 : index
    %c0_5 = arith.constant 0 : index
    %5 = vector.load %arg4[%c0_3, %c0_4, %c0_5] : memref<2x1x128xf32, #tpu.memory_space<vmem>>, vector<1x1x128xf32>
    %6 = vector.shape_cast %5 : vector<1x1x128xf32> to vector<1x128xf32>
    %7 = vector.broadcast %6 : vector<1x128xf32> to vector<16x128xf32>
    %8 = arith.addf %4, %7 : vector<16x128xf32>
    %cst_6 = arith.constant 0.000000e+00 : f32
    %9 = vector.broadcast %cst_6 : f32 to vector<16x128xf32>
    %10 = arith.maximumf %8, %9 : vector<16x128xf32>
    %11 = arith.truncf %10 : vector<16x128xf32> to vector<16x128xbf16>
    %c0_7 = arith.constant 0 : index
    %c0_8 = arith.constant 0 : index
    %c0_9 = arith.constant 0 : index
    %12 = vector.load %arg5[%c0_7, %c0_8, %c0_9] : memref<2x128x128xbf16, #tpu.memory_space<vmem>>, vector<1x128x128xbf16>
    %13 = vector.shape_cast %12 : vector<1x128x128xbf16> to vector<128x128xbf16>
    %cst_10 = arith.constant dense<0.000000e+00> : vector<16x128xf32>
    %14 = tpu.matmul %11, %13, %cst_10 {dimension_numbers = #tpu.dot_dimension_numbers<[1], [0], [0], [1], [0, 0, 1, 1], [], []>} : vector<16x128xbf16>, vector<128x128xbf16>, vector<16x128xf32> -> vector<16x128xf32>
    %c0_11 = arith.constant 0 : index
    %c0_12 = arith.constant 0 : index
    %c0_13 = arith.constant 0 : index
    %15 = vector.load %arg6[%c0_11, %c0_12, %c0_13] : memref<2x1x128xf32, #tpu.memory_space<vmem>>, vector<1x1x128xf32>
    %16 = vector.shape_cast %15 : vector<1x1x128xf32> to vector<1x128xf32>
    %17 = vector.broadcast %16 : vector<1x128xf32> to vector<16x128xf32>
    %18 = arith.addf %14, %17 : vector<16x128xf32>
    %cst_14 = arith.constant 0.000000e+00 : f32
    %19 = vector.broadcast %cst_14 : f32 to vector<16x128xf32>
    %20 = arith.maximumf %18, %19 : vector<16x128xf32>
    %21 = arith.truncf %20 : vector<16x128xf32> to vector<16x128xbf16>
    %c0_15 = arith.constant 0 : index
    %c0_16 = arith.constant 0 : index
    %c0_17 = arith.constant 0 : index
    %22 = vector.load %arg7[%c0_15, %c0_16, %c0_17] : memref<2x128x128xbf16, #tpu.memory_space<vmem>>, vector<1x128x128xbf16>
    %23 = vector.shape_cast %22 : vector<1x128x128xbf16> to vector<128x128xbf16>
    %cst_18 = arith.constant dense<0.000000e+00> : vector<16x128xf32>
    %24 = tpu.matmul %21, %23, %cst_18 {dimension_numbers = #tpu.dot_dimension_numbers<[1], [0], [0], [1], [0, 0, 1, 1], [], []>} : vector<16x128xbf16>, vector<128x128xbf16>, vector<16x128xf32> -> vector<16x128xf32>
    %c0_19 = arith.constant 0 : index
    %c0_20 = arith.constant 0 : index
    %c0_21 = arith.constant 0 : index
    %25 = vector.load %arg8[%c0_19, %c0_20, %c0_21] : memref<2x1x128xf32, #tpu.memory_space<vmem>>, vector<1x1x128xf32>
    %26 = vector.shape_cast %25 : vector<1x1x128xf32> to vector<1x128xf32>
    %27 = vector.broadcast %26 : vector<1x128xf32> to vector<16x128xf32>
    %28 = arith.addf %24, %27 : vector<16x128xf32>
    %cst_22 = arith.constant 0.000000e+00 : f32
    %29 = vector.broadcast %cst_22 : f32 to vector<16x128xf32>
    %30 = arith.maximumf %28, %29 : vector<16x128xf32>
    %31 = arith.truncf %30 : vector<16x128xf32> to vector<16x128xbf16>
    %c0_23 = arith.constant 0 : index
    %c0_24 = arith.constant 0 : index
    %c0_25 = arith.constant 0 : index
    %32 = vector.load %arg9[%c0_23, %c0_24, %c0_25] : memref<2x128x32xbf16, #tpu.memory_space<vmem>>, vector<1x128x32xbf16>
    %33 = vector.shape_cast %32 : vector<1x128x32xbf16> to vector<128x32xbf16>
    %cst_26 = arith.constant dense<0.000000e+00> : vector<16x32xf32>
    %34 = tpu.matmul %31, %33, %cst_26 {dimension_numbers = #tpu.dot_dimension_numbers<[1], [0], [0], [1], [0, 0, 1, 1], [], []>} : vector<16x128xbf16>, vector<128x32xbf16>, vector<16x32xf32> -> vector<16x32xf32>
    %c0_27 = arith.constant 0 : index
    %c0_28 = arith.constant 0 : index
    %c0_29 = arith.constant 0 : index
    %35 = vector.load %arg10[%c0_27, %c0_28, %c0_29] : memref<2x1x32xf32, #tpu.memory_space<vmem>>, vector<1x1x32xf32>
    %36 = vector.shape_cast %35 : vector<1x1x32xf32> to vector<1x32xf32>
    %37 = vector.broadcast %36 : vector<1x32xf32> to vector<16x32xf32>
    %38 = arith.addf %34, %37 : vector<16x32xf32>
    %39 = vector.extract_strided_slice %38 {offsets = [0, 0], sizes = [16, 16], strides = [1, 1]} : vector<16x32xf32> to vector<16x16xf32>
    %40 = vector.extract_strided_slice %38 {offsets = [0, 16], sizes = [16, 16], strides = [1, 1]} : vector<16x32xf32> to vector<16x16xf32>
    %cst_30 = arith.constant -1.000000e+01 : f32
    %cst_31 = arith.constant 1.000000e+01 : f32
    %41 = vector.broadcast %cst_30 : f32 to vector<16x16xf32>
    %42 = arith.maximumf %41, %40 : vector<16x16xf32>
    %43 = vector.broadcast %cst_31 : f32 to vector<16x16xf32>
    %44 = arith.minimumf %43, %42 : vector<16x16xf32>
    %cst_32 = arith.constant 5.000000e-01 : f32
    %45 = vector.broadcast %cst_32 : f32 to vector<16x16xf32>
    %46 = arith.mulf %45, %44 : vector<16x16xf32>
    %47 = math.exp %46 : vector<16x16xf32>
    %c0_33 = arith.constant 0 : index
    %c0_34 = arith.constant 0 : index
    %c0_35 = arith.constant 0 : index
    %48 = vector.load %arg11[%c0_33, %c0_34, %c0_35] : memref<2x16x16xf32, #tpu.memory_space<vmem>>, vector<1x16x16xf32>
    %49 = vector.shape_cast %48 : vector<1x16x16xf32> to vector<16x16xf32>
    %50 = arith.mulf %47, %49 : vector<16x16xf32>
    %51 = arith.addf %39, %50 : vector<16x16xf32>
    %52 = tpu.iota {dimensions = array<i32: 1>} : vector<16x32xi32>
    %c16_i32 = arith.constant 16 : i32
    %53 = vector.broadcast %c16_i32 : i32 to vector<16x32xi32>
    %54 = arith.cmpi sge, %52, %53 : vector<16x32xi32>
    %cst_36 = arith.constant -1.000000e+01 : f32
    %cst_37 = arith.constant 1.000000e+01 : f32
    %55 = vector.broadcast %cst_36 : f32 to vector<16x32xf32>
    %56 = arith.maximumf %55, %38 : vector<16x32xf32>
    %57 = vector.broadcast %cst_37 : f32 to vector<16x32xf32>
    %58 = arith.minimumf %57, %56 : vector<16x32xf32>
    %59 = arith.select %54, %58, %38 : vector<16x32xi1>, vector<16x32xf32>
    %c0_38 = arith.constant 0 : index
    %c0_39 = arith.constant 0 : index
    %c0_40 = arith.constant 0 : index
    %60 = vector.load %arg12[%c0_38, %c0_39, %c0_40] : memref<2x16x48xf32, #tpu.memory_space<vmem>>, vector<1x16x32xf32>
    %61 = vector.shape_cast %60 : vector<1x16x32xf32> to vector<16x32xf32>
    %62 = vector.shape_cast %59 : vector<16x32xf32> to vector<1x16x32xf32>
    tpu.vector_store %arg12[%c0_38, %c0_39, %c0_40], %62 {strides = array<i32>} : memref<2x16x48xf32, #tpu.memory_space<vmem>>, vector<1x16x32xf32>,
    %c0_41 = arith.constant 0 : index
    %c0_42 = arith.constant 0 : index
    %c32 = arith.constant 32 : index
    %63 = vector.load %arg12[%c0_41, %c0_42, %c32] : memref<2x16x48xf32, #tpu.memory_space<vmem>>, vector<1x16x16xf32>
    %64 = vector.shape_cast %63 : vector<1x16x16xf32> to vector<16x16xf32>
    %65 = vector.shape_cast %51 : vector<16x16xf32> to vector<1x16x16xf32>
    tpu.vector_store %arg12[%c0_41, %c0_42, %c32], %65 {strides = array<i32>} : memref<2x16x48xf32, #tpu.memory_space<vmem>>, vector<1x16x16xf32>,
    %66 = arith.truncf %51 : vector<16x16xf32> to vector<16x16xbf16>
    %67 = vector.extract_strided_slice %3 {offsets = [0, 128], sizes = [16, 128], strides = [1, 1]} : vector<16x256xf32> to vector<16x128xf32>
    %c1 = arith.constant 1 : index
    %c0_43 = arith.constant 0 : index
    %c0_44 = arith.constant 0 : index
    %68 = vector.load %arg4[%c1, %c0_43, %c0_44] : memref<2x1x128xf32, #tpu.memory_space<vmem>>, vector<1x1x128xf32>
    %69 = vector.shape_cast %68 : vector<1x1x128xf32> to vector<1x128xf32>
    %70 = vector.broadcast %69 : vector<1x128xf32> to vector<16x128xf32>
    %71 = arith.addf %67, %70 : vector<16x128xf32>
    %c0_45 = arith.constant 0 : index
    %c0_46 = arith.constant 0 : index
    %c0_47 = arith.constant 0 : index
    %72 = vector.load %arg3[%c0_45, %c0_46, %c0_47] : memref<1x16x128xbf16, #tpu.memory_space<vmem>>, vector<1x16x128xbf16>
    %73 = vector.shape_cast %72 : vector<1x16x128xbf16> to vector<16x128xbf16>
    %cst_48 = arith.constant dense<0.000000e+00> : vector<16x128xf32>
    %74 = tpu.matmul %66, %73, %cst_48 {dimension_numbers = #tpu.dot_dimension_numbers<[1], [0], [0], [1], [0, 0, 1, 1], [], []>} : vector<16x16xbf16>, vector<16x128xbf16>, vector<16x128xf32> -> vector<16x128xf32>
    %75 = arith.addf %71, %74 : vector<16x128xf32>
    %cst_49 = arith.constant 0.000000e+00 : f32
    %76 = vector.broadcast %cst_49 : f32 to vector<16x128xf32>
    %77 = arith.maximumf %75, %76 : vector<16x128xf32>
    %78 = arith.truncf %77 : vector<16x128xf32> to vector<16x128xbf16>
    %c1_50 = arith.constant 1 : index
    %c0_51 = arith.constant 0 : index
    %c0_52 = arith.constant 0 : index
    %79 = vector.load %arg5[%c1_50, %c0_51, %c0_52] : memref<2x128x128xbf16, #tpu.memory_space<vmem>>, vector<1x128x128xbf16>
    %80 = vector.shape_cast %79 : vector<1x128x128xbf16> to vector<128x128xbf16>
    %cst_53 = arith.constant dense<0.000000e+00> : vector<16x128xf32>
    %81 = tpu.matmul %78, %80, %cst_53 {dimension_numbers = #tpu.dot_dimension_numbers<[1], [0], [0], [1], [0, 0, 1, 1], [], []>} : vector<16x128xbf16>, vector<128x128xbf16>, vector<16x128xf32> -> vector<16x128xf32>
    %c1_54 = arith.constant 1 : index
    %c0_55 = arith.constant 0 : index
    %c0_56 = arith.constant 0 : index
    %82 = vector.load %arg6[%c1_54, %c0_55, %c0_56] : memref<2x1x128xf32, #tpu.memory_space<vmem>>, vector<1x1x128xf32>
    %83 = vector.shape_cast %82 : vector<1x1x128xf32> to vector<1x128xf32>
    %84 = vector.broadcast %83 : vector<1x128xf32> to vector<16x128xf32>
    %85 = arith.addf %81, %84 : vector<16x128xf32>
    %cst_57 = arith.constant 0.000000e+00 : f32
    %86 = vector.broadcast %cst_57 : f32 to vector<16x128xf32>
    %87 = arith.maximumf %85, %86 : vector<16x128xf32>
    %88 = arith.truncf %87 : vector<16x128xf32> to vector<16x128xbf16>
    %c1_58 = arith.constant 1 : index
    %c0_59 = arith.constant 0 : index
    %c0_60 = arith.constant 0 : index
    %89 = vector.load %arg7[%c1_58, %c0_59, %c0_60] : memref<2x128x128xbf16, #tpu.memory_space<vmem>>, vector<1x128x128xbf16>
    %90 = vector.shape_cast %89 : vector<1x128x128xbf16> to vector<128x128xbf16>
    %cst_61 = arith.constant dense<0.000000e+00> : vector<16x128xf32>
    %91 = tpu.matmul %88, %90, %cst_61 {dimension_numbers = #tpu.dot_dimension_numbers<[1], [0], [0], [1], [0, 0, 1, 1], [], []>} : vector<16x128xbf16>, vector<128x128xbf16>, vector<16x128xf32> -> vector<16x128xf32>
    %c1_62 = arith.constant 1 : index
    %c0_63 = arith.constant 0 : index
    %c0_64 = arith.constant 0 : index
    %92 = vector.load %arg8[%c1_62, %c0_63, %c0_64] : memref<2x1x128xf32, #tpu.memory_space<vmem>>, vector<1x1x128xf32>
    %93 = vector.shape_cast %92 : vector<1x1x128xf32> to vector<1x128xf32>
    %94 = vector.broadcast %93 : vector<1x128xf32> to vector<16x128xf32>
    %95 = arith.addf %91, %94 : vector<16x128xf32>
    %cst_65 = arith.constant 0.000000e+00 : f32
    %96 = vector.broadcast %cst_65 : f32 to vector<16x128xf32>
    %97 = arith.maximumf %95, %96 : vector<16x128xf32>
    %98 = arith.truncf %97 : vector<16x128xf32> to vector<16x128xbf16>
    %c1_66 = arith.constant 1 : index
    %c0_67 = arith.constant 0 : index
    %c0_68 = arith.constant 0 : index
    %99 = vector.load %arg9[%c1_66, %c0_67, %c0_68] : memref<2x128x32xbf16, #tpu.memory_space<vmem>>, vector<1x128x32xbf16>
    %100 = vector.shape_cast %99 : vector<1x128x32xbf16> to vector<128x32xbf16>
    %cst_69 = arith.constant dense<0.000000e+00> : vector<16x32xf32>
    %101 = tpu.matmul %98, %100, %cst_69 {dimension_numbers = #tpu.dot_dimension_numbers<[1], [0], [0], [1], [0, 0, 1, 1], [], []>} : vector<16x128xbf16>, vector<128x32xbf16>, vector<16x32xf32> -> vector<16x32xf32>
    %c1_70 = arith.constant 1 : index
    %c0_71 = arith.constant 0 : index
    %c0_72 = arith.constant 0 : index
    %102 = vector.load %arg10[%c1_70, %c0_71, %c0_72] : memref<2x1x32xf32, #tpu.memory_space<vmem>>, vector<1x1x32xf32>
    %103 = vector.shape_cast %102 : vector<1x1x32xf32> to vector<1x32xf32>
    %104 = vector.broadcast %103 : vector<1x32xf32> to vector<16x32xf32>
    %105 = arith.addf %101, %104 : vector<16x32xf32>
    %106 = vector.extract_strided_slice %105 {offsets = [0, 0], sizes = [16, 16], strides = [1, 1]} : vector<16x32xf32> to vector<16x16xf32>
    %107 = vector.extract_strided_slice %105 {offsets = [0, 16], sizes = [16, 16], strides = [1, 1]} : vector<16x32xf32> to vector<16x16xf32>
    %cst_73 = arith.constant -1.000000e+01 : f32
    %cst_74 = arith.constant 1.000000e+01 : f32
    %108 = vector.broadcast %cst_73 : f32 to vector<16x16xf32>
    %109 = arith.maximumf %108, %107 : vector<16x16xf32>
    %110 = vector.broadcast %cst_74 : f32 to vector<16x16xf32>
    %111 = arith.minimumf %110, %109 : vector<16x16xf32>
    %cst_75 = arith.constant 5.000000e-01 : f32
    %112 = vector.broadcast %cst_75 : f32 to vector<16x16xf32>
    %113 = arith.mulf %112, %111 : vector<16x16xf32>
    %114 = math.exp %113 : vector<16x16xf32>
    %c1_76 = arith.constant 1 : index
    %c0_77 = arith.constant 0 : index
    %c0_78 = arith.constant 0 : index
    %115 = vector.load %arg11[%c1_76, %c0_77, %c0_78] : memref<2x16x16xf32, #tpu.memory_space<vmem>>, vector<1x16x16xf32>
    %116 = vector.shape_cast %115 : vector<1x16x16xf32> to vector<16x16xf32>
    %117 = arith.mulf %114, %116 : vector<16x16xf32>
    %118 = arith.addf %106, %117 : vector<16x16xf32>
    %119 = tpu.iota {dimensions = array<i32: 1>} : vector<16x32xi32>
    %c16_i32_79 = arith.constant 16 : i32
    %120 = vector.broadcast %c16_i32_79 : i32 to vector<16x32xi32>
    %121 = arith.cmpi sge, %119, %120 : vector<16x32xi32>
    %cst_80 = arith.constant -1.000000e+01 : f32
    %cst_81 = arith.constant 1.000000e+01 : f32
    %122 = vector.broadcast %cst_80 : f32 to vector<16x32xf32>
    %123 = arith.maximumf %122, %105 : vector<16x32xf32>
    %124 = vector.broadcast %cst_81 : f32 to vector<16x32xf32>
    %125 = arith.minimumf %124, %123 : vector<16x32xf32>
    %126 = arith.select %121, %125, %105 : vector<16x32xi1>, vector<16x32xf32>
    %c1_82 = arith.constant 1 : index
    %c0_83 = arith.constant 0 : index
    %c0_84 = arith.constant 0 : index
    %127 = vector.load %arg12[%c1_82, %c0_83, %c0_84] : memref<2x16x48xf32, #tpu.memory_space<vmem>>, vector<1x16x32xf32>
    %128 = vector.shape_cast %127 : vector<1x16x32xf32> to vector<16x32xf32>
    %129 = vector.shape_cast %126 : vector<16x32xf32> to vector<1x16x32xf32>
    tpu.vector_store %arg12[%c1_82, %c0_83, %c0_84], %129 {strides = array<i32>} : memref<2x16x48xf32, #tpu.memory_space<vmem>>, vector<1x16x32xf32>,
    %c1_85 = arith.constant 1 : index
    %c0_86 = arith.constant 0 : index
    %c32_87 = arith.constant 32 : index
    %130 = vector.load %arg12[%c1_85, %c0_86, %c32_87] : memref<2x16x48xf32, #tpu.memory_space<vmem>>, vector<1x16x16xf32>
    %131 = vector.shape_cast %130 : vector<1x16x16xf32> to vector<16x16xf32>
    %132 = vector.shape_cast %118 : vector<16x16xf32> to vector<1x16x16xf32>
    tpu.vector_store %arg12[%c1_85, %c0_86, %c32_87], %132 {strides = array<i32>} : memref<2x16x48xf32, #tpu.memory_space<vmem>>, vector<1x16x16xf32>,
    return
  }
  func.func @transform_0(%arg0: i32) -> (i32, i32) {
    %c0_i32 = arith.constant 0 : i32
    %c0_i32_0 = arith.constant 0 : i32
    return %arg0, %c0_i32 : i32, i32
  }
  func.func @transform_1(%arg0: i32) -> (i32, i32) {
    %c0_i32 = arith.constant 0 : i32
    %c0_i32_0 = arith.constant 0 : i32
    %c0_i32_1 = arith.constant 0 : i32
    return %c0_i32, %c0_i32_0 : i32, i32
  }
  func.func @transform_2(%arg0: i32) -> (i32, i32, i32) {
    %c0_i32 = arith.constant 0 : i32
    %c0_i32_0 = arith.constant 0 : i32
    %c0_i32_1 = arith.constant 0 : i32
    %c0_i32_2 = arith.constant 0 : i32
    return %c0_i32, %c0_i32_0, %c0_i32_1 : i32, i32, i32
  }
  func.func @transform_3(%arg0: i32) -> (i32, i32, i32) {
    %c0_i32 = arith.constant 0 : i32
    %c0_i32_0 = arith.constant 0 : i32
    %c0_i32_1 = arith.constant 0 : i32
    %c0_i32_2 = arith.constant 0 : i32
    return %c0_i32, %c0_i32_0, %c0_i32_1 : i32, i32, i32
  }
  func.func @transform_4(%arg0: i32) -> (i32, i32, i32) {
    %c0_i32 = arith.constant 0 : i32
    %c0_i32_0 = arith.constant 0 : i32
    %c0_i32_1 = arith.constant 0 : i32
    %c0_i32_2 = arith.constant 0 : i32
    return %c0_i32, %c0_i32_0, %c0_i32_1 : i32, i32, i32
  }
  func.func @transform_5(%arg0: i32) -> (i32, i32, i32) {
    %c0_i32 = arith.constant 0 : i32
    %c0_i32_0 = arith.constant 0 : i32
    %c0_i32_1 = arith.constant 0 : i32
    %c0_i32_2 = arith.constant 0 : i32
    return %c0_i32, %c0_i32_0, %c0_i32_1 : i32, i32, i32
  }
  func.func @transform_6(%arg0: i32) -> (i32, i32, i32) {
    %c0_i32 = arith.constant 0 : i32
    %c0_i32_0 = arith.constant 0 : i32
    %c0_i32_1 = arith.constant 0 : i32
    %c0_i32_2 = arith.constant 0 : i32
    return %c0_i32, %c0_i32_0, %c0_i32_1 : i32, i32, i32
  }
  func.func @transform_7(%arg0: i32) -> (i32, i32, i32) {
    %c0_i32 = arith.constant 0 : i32
    %c0_i32_0 = arith.constant 0 : i32
    %c0_i32_1 = arith.constant 0 : i32
    %c0_i32_2 = arith.constant 0 : i32
    return %c0_i32, %c0_i32_0, %c0_i32_1 : i32, i32, i32
  }
  func.func @transform_8(%arg0: i32) -> (i32, i32, i32) {
    %c0_i32 = arith.constant 0 : i32
    %c0_i32_0 = arith.constant 0 : i32
    %c0_i32_1 = arith.constant 0 : i32
    %c0_i32_2 = arith.constant 0 : i32
    return %c0_i32, %c0_i32_0, %c0_i32_1 : i32, i32, i32
  }
  func.func @transform_9(%arg0: i32) -> (i32, i32, i32) {
    %c0_i32 = arith.constant 0 : i32
    %c0_i32_0 = arith.constant 0 : i32
    %c0_i32_1 = arith.constant 0 : i32
    %c0_i32_2 = arith.constant 0 : i32
    return %c0_i32, %c0_i32_0, %c0_i32_1 : i32, i32, i32
  }
  func.func @transform_10(%arg0: i32) -> (i32, i32, i32) {
    %c0_i32 = arith.constant 0 : i32
    %c0_i32_0 = arith.constant 0 : i32
    %c0_i32_1 = arith.constant 0 : i32
    return %c0_i32, %arg0, %c0_i32_0 : i32, i32, i32
  }
  func.func @transform_11(%arg0: i32) -> (i32, i32, i32) {
    %c0_i32 = arith.constant 0 : i32
    %c0_i32_0 = arith.constant 0 : i32
    %c0_i32_1 = arith.constant 0 : i32
    return %c0_i32, %arg0, %c0_i32_0 : i32, i32, i32
  }
}

</mosaic_0001>

<bundles_post_ra>
// kernel: tpu_custom_call.1
= control target key start
LH: loop header
LB: loop body
LE: loop exit
PB: predicated region body
PF: predicated region fallthrough
CT: control target
= control target key end

     0   :  { %16 = vsyncpa [#allocation3], 0  ;;  %s1896_s0 = inlined_call_operand.hbm [shape: f32[16,64], index: 0, kind: input, shape index: {}]   ;;  %s1897_s1 = inlined_call_operand.hbm [shape: bf16[64,256], index: 1, kind: input, shape index: {}]   ;;  %s1898_s2 = inlined_call_operand.hbm [shape: bf16[1,16,128], index: 2, kind: input, shape index: {}]   ;;  %s1899_s3 = inlined_call_operand.vmem [shape: f32[2,1,128], index: 3, kind: input, shape index: {}]   ;;  %s1900_s4 = inlined_call_operand.vmem [shape: bf16[2,128,128], index: 4, kind: input, shape index: {}]   ;;  %s1901_s5 = inlined_call_operand.vmem [shape: f32[2,1,128], index: 5, kind: input, shape index: {}]   ;;  %s1902_s6 = inlined_call_operand.hbm [shape: bf16[2,128,128], index: 6, kind: input, shape index: {}]   ;;  %s1903_s7 = inlined_call_operand.vmem [shape: f32[2,1,128], index: 7, kind: input, shape index: {}]   ;;  %s1904_s8 = inlined_call_operand.vmem [shape: bf16[2,128,32], index: 8, kind: input, shape index: {}]   ;;  %s1905_s9 = inlined_call_operand.vmem [shape: f32[2,1,32], index: 9, kind: input, shape index: {}]   ;;  %s1906_s10 = inlined_call_operand.vmem [shape: f32[2,16,16], index: 10, kind: input, shape index: {}]   ;;  %s1907_s11 = inlined_call_operand.hbm [shape: f32[2,16,48], index: 11, kind: output, shape index: {}]  }
   0x1   :  { %17 = vsyncpa [#allocation6], 0 }
   0x2   :  { %18 = vsyncpa [#allocation9], 0 }
   0x3   :  { %19 = vsyncpa [#allocation4], 0  ;;  %s1565_s17 = smov [#allocation5]   ;;  %s1566_s19 = smov [#allocation2]  }
   0x4   :  { %s37_s18 = sshll.u32 %s1565_s17, 4  ;;  %s25_s20 = sshll.u32 %s1566_s19, 4  ;;  %s38_s18 = int_to_ptr.vmem [resolvable:$true] %s37_s18  ;;  %s26_s20 = int_to_ptr.vmem [resolvable:$true] %s25_s20 }
   0x5   :  { %s1465_s21 = scalar_lea.vmem %s38_s18, 1024  ;;  %p1470_p1 = scmp.lt.s32.totalorder %s38_s18, %s38_s18 }
   0x6   :  { %p1466_p0 = scmp.ne.s32.totalorder %s38_s18, %s1465_s21  ;;  %p1471_p2 = scmp.lt.s32.totalorder %s1465_s21, %s1465_s21 }
   0x8   :  { %p1472_p3 = por %p1471_p2, %p1470_p1 }
   0xa   :  { %p1473_p4 = pnand %p1472_p3, %p1466_p0 }
   0xc   :  { %1476 = shalt.err (!%p1473_p4)
}
   0xd   :  { %s1567_s22 = smov 128   ;;  %s1568_s23 = smov 8  }
   0xe   :  { %43 = dma.hbm_to_vmem [thread:$0]  %s1897_s1, 1024, %s38_s18, [#allocation6], %s1567_s22, %s1567_s22, %s1568_s23  }
   0xf   :  { %s1485_s26 = scalar_lea.vmem %s26_s20, 256  ;;  %p1490_p6 = scmp.lt.s32.totalorder %s26_s20, %s26_s20 }
  0x10   :  { %p1486_p5 = scmp.ne.s32.totalorder %s26_s20, %s1485_s26  ;;  %p1491_p7 = scmp.lt.s32.totalorder %s1485_s26, %s1485_s26 }
  0x12   :  { %p1492_p8 = por %p1491_p7, %p1490_p6 }
  0x14   :  { %p1493_p9 = pnand %p1492_p8, %p1486_p5 }
  0x16   :  { %1496 = shalt.err (!%p1493_p9)
}
  0x17   :  { %31 = dma.hbm_to_vmem [thread:$0]  %s1896_s0, 256, %s26_s20, [#allocation3], %s1567_s22, %s1567_s22, %s1568_s23  }
  0x18   :  { %s1569_s29 = smov [#allocation7]  }
  0x19   :  { %s49_s30 = sshll.u32 %s1569_s29, 4  ;;  %s50_s30 = int_to_ptr.vmem [resolvable:$true] %s49_s30 }
  0x1a   :  { %s1505_s12 = scalar_lea.vmem %s50_s30, 128  ;;  %p1510_p11 = scmp.lt.s32.totalorder %s50_s30, %s50_s30 }
  0x1b   :  { %p1506_p10 = scmp.ne.s32.totalorder %s50_s30, %s1505_s12  ;;  %p1511_p12 = scmp.lt.s32.totalorder %s1505_s12, %s1505_s12 }
  0x1d   :  { %p1512_p13 = por %p1511_p12, %p1510_p11 }
  0x1f   :  { %p1513_p0 = pnand %p1512_p13, %p1506_p10 }
  0x21   :  { %1516 = shalt.err (!%p1513_p0)
}
  0x22   :  { %s1570_s1 = smov 64   ;;  %s1571_s13 = smov 4  }
  0x23   :  { %55 = dma.hbm_to_vmem [thread:$0]  %s1898_s2, 128, %s50_s30, [#allocation6], %s1570_s1, %s1570_s1, %s1571_s13  }
  0x24   :  { %s1572_s16 = smov [#allocation8]  }
  0x25   :  { %s67_s17 = sshll.u32 %s1572_s16, 4  ;;  %s68_s17 = int_to_ptr.vmem [resolvable:$true] %s67_s17 }
  0x26   :  { %s1525_s0 = scalar_lea.vmem %s68_s17, 2048  ;;  %p1530_p2 = scmp.lt.s32.totalorder %s68_s17, %s68_s17 }
  0x27   :  { %p1526_p1 = scmp.ne.s32.totalorder %s68_s17, %s1525_s0  ;;  %p1531_p3 = scmp.lt.s32.totalorder %s1525_s0, %s1525_s0 }
  0x29   :  { %p1532_p4 = por %p1531_p3, %p1530_p2 }
  0x2b   :  { %p1533_p5 = pnand %p1532_p4, %p1526_p1 }
  0x2d   :  { %1536 = shalt.err (!%p1533_p5)
}
  0x2e   :  { %73 = dma.hbm_to_vmem [thread:$0]  %s1902_s6, 2048, %s68_s17, [#allocation9], %s1570_s1, %s1570_s1, %s1571_s13  }
  0x2f   :  { %1557 = dma.done.wait [#allocation3], 256  }
  0x30   :  { %1558 = vsyncadd [#allocation3], 4294967040 }
  0x31   :  { %1559 = dma.done.wait [#allocation6], 1152  }
  0x32   :  { %1560 = vsyncadd [#allocation6], 4294966144 }
  0x33   :  { %1561 = dma.done.wait [#allocation9], 2048  }
  0x34   :  { %1562 = vsyncadd [#allocation9], 4294965248  ;;  %v1573_v0 = vmov 0   ;;  %v1574_v1 = vmov 0.0   ;;  %v1388_v2 = vld [vmem:[#allocation5 + $0x34] ss:$8 sps:$4 sm:$0xff]  }
  0x35   :  { %182 = vmatprep.mubr.bf16.mxu1 %v1573_v0  ;;  %1267 = vmatprep.subr.bf16.mxu0 %v1574_v1  ;;  %v1390_v3 = vld [vmem:[#allocation5 + $0x30] ss:$8 sps:$4 sm:$0xff]   ;;  %v1391_v4 = vld [vmem:[#allocation5 + $0x24] ss:$8 sps:$4 sm:$0xff]   ;;  %v1393_v5 = vld [vmem:[#allocation5 + $0x20] ss:$8 sps:$4 sm:$0xff]  }
  0x36   :  { %158 = vmatprep.subr.bf16.mxu1 %v1388_v2  ;;  %v1394_v6 = vld [vmem:[#allocation5 + $0x14] ss:$8 sps:$4 sm:$0xff]   ;;  %v1396_v7 = vld [vmem:[#allocation5 + $0x10] ss:$8 sps:$4 sm:$0xff]   ;;  %v1397_v8 = vld [vmem:[#allocation5 + $0x4] ss:$8 sps:$4 sm:$0xff]  }
  0x37   :  { %159 = vmatpush1.bf16.msra.mxu1 %v1390_v3  ;;  %v1399_v9 = vld [vmem:[#allocation5] ss:$8 sps:$4 sm:$0xff]   ;;  %v95_v10 = vld [vmem:[#allocation2] sm:$0xff]  ;;  %v96_v11 = vld [vmem:[#allocation2 + $0x8] sm:$0xff]  ;;  %vm146_vm0 = vcmask 523264   ;;  %vm1575_vm1 = vmmov 0  }
  0x38   :  { %160 = vmatprep.subr.bf16.mxu1 %v1391_v4  ;;  %v1400_v12 = vld [vmem:[%s1900_s4 + $0x38] sm:$0xff]   ;;  %v97_v13 = vpack.c.bf16 %v96_v11, %v95_v10  ;;  %v1401_v14 = vld [vmem:[%s1900_s4 + $0x30] sm:$0xff]   ;;  %v1402_v15 = vld [vmem:[%s1900_s4 + $0x28] sm:$0xff]   ;;  %1283 = vmatprep.mubr.msk.bf16.mxu0 %vm1575_vm1, %v1574_v1  ;;  %s1576_s17 = smov 16   ;;  %vm584_vm3 = vcmask 261120   ;;  %s1577_s21 = smov 112  }
  0x39   :  { %v1403_v16 = vld [vmem:[%s1900_s4 + $0x20] sm:$0xff]   ;;  %v1404_v17 = vld [vmem:[%s1900_s4 + $0x18] sm:$0xff]   ;;  %v1405_v18 = vld [vmem:[%s1900_s4 + $0x10] sm:$0xff]   ;;  %vm617_vm4 = vcmask 130048   ;;  %vm595_vm5 = vcmask 392448  }
  0x3a   :  { %v1406_v19 = vld [vmem:[%s1900_s4 + $0x8] sm:$0xff]   ;;  %v1407_v20 = vld [vmem:[%s1900_s4] sm:$0xff]   ;;  %v1408_v21 = vld [vmem:[#allocation8 + $0x38] sm:$0xff]  }
  0x3b   :  { %161 = vmatpush1.bf16.msra.mxu1 %v1393_v5  ;;  %1268 = vmatpush3.bf16.msra.mxu0 %v1408_v21  ;;  %v1409_v22 = vld [vmem:[#allocation8 + $0x30] sm:$0xff]   ;;  %v1410_v23 = vld [vmem:[#allocation8 + $0x28] sm:$0xff]   ;;  %v1411_v24 = vld [vmem:[#allocation8 + $0x20] sm:$0xff]  }
  0x3c   :  { %162 = vmatprep.subr.bf16.mxu1 %v1394_v6  ;;  %1269 = vmatprep.subr.bf16.mxu0 %v1574_v1  ;;  %v1412_v25 = vld [vmem:[#allocation8 + $0x18] sm:$0xff]   ;;  %v1091_v27 = vld [vmem:[%s1899_s3] ss:$0 sm:$0xff]  ;;  %v1413_v35 = vld [vmem:[#allocation8 + $0x10] sm:$0xff]   ;;  %v579_v6 = vlaneseq }
  0x3d   :  { %v1414_v36 = vld [vmem:[#allocation8 + $0x8] sm:$0xff]   ;;  %v1415_v37 = vld [vmem:[#allocation8] sm:$0xff]   ;;  %v1417_v39 = vld [vmem:[%s1904_s8 + $0x30] sm:$0xff]  }
  0x3e   :  { %v1416_v38 = vld [vmem:[%s1904_s8 + $0x38] sm:$0xff]   ;;  %v1418_v40 = vld [vmem:[%s1904_s8 + $0x28] sm:$0xff]   ;;  %v1419_v41 = vld [vmem:[%s1904_s8 + $0x20] sm:$0xff]  }
  0x3f   :  { %163 = vmatpush1.bf16.msra.mxu1 %v1396_v7  ;;  %1270 = vmatpush3.bf16.msra.mxu0 %v1409_v22  ;;  %v1420_v42 = vld [vmem:[%s1904_s8 + $0x18] sm:$0xff]   ;;  %v1092_v44 = vld [vmem:[%s1901_s5] ss:$0 sm:$0xff]  ;;  %v1421_v54 = vld [vmem:[%s1904_s8 + $0x10] sm:$0xff]  }
  0x40   :  { %164 = vmatprep.subr.bf16.mxu1 %v1397_v8  ;;  %1271 = vmatprep.subr.bf16.mxu0 %v1574_v1  ;;  %v1422_v55 = vld [vmem:[%s1904_s8 + $0x8] sm:$0xff]   ;;  %v1423_v56 = vld [vmem:[%s1904_s8] sm:$0xff]   ;;  %v1766_v8 = vand.u32 127, %v579_v6 }
  0x41   :  { %v557_v57 = vld [vmem:[%s1906_s10] sm:$0xff]  ;;  %v558_v58 = vld [vmem:[%s1906_s10 + $0x8] sm:$0xff] }
  0x42   :  { %561 = vrot.lane.b32.xlu0 %v557_v57, %s1576_s17  ;;  %v1101_v59 = vld [vmem:[%s1903_s7] ss:$0 sm:$0xff]  ;;  %vm581_vm2 = vcmp.ge.s32.totalorder %v1766_v8, 16 }
  0x43   :  { %165 = vmatpush1.bf16.msra.mxu1 %v1399_v9  ;;  %1272 = vmatpush3.bf16.msra.mxu0 %v1410_v23  ;;  %v1110_v7 = vld [vmem:[%s1905_s9] ss:$0 sm:$0xff]  ;;  %v1424_v23 = vld [vmem:[#allocation7] sm:$0xff]  }
  0x44   :  { %1247 = vmatprep.subr.bf16.mxu1 %v1574_v1  ;;  %1273 = vmatprep.subr.bf16.mxu0 %v1574_v1 }
  0x46   :  { %1090 = vmatmul.mubr.msk.bf16.vlgmr.msra.gmra.mxu1 %vm146_vm0, %v97_v13  ;;  %563 = vrot.lane.b32.xlu0 %v558_v58, %s1576_s17 }
  0x47   :  { %1248 = vmatpush3.bf16.msra.mxu1 %v1400_v12  ;;  %1263 = vmatprep.mubr.msk.bf16.mxu1 %vm1575_vm1, %v1574_v1 }
  0x48   :  { %1249 = vmatprep.subr.bf16.mxu1 %v1574_v1  ;;  %1274 = vmatpush3.bf16.msra.mxu0 %v1411_v24 }
  0x49   :  { %1275 = vmatprep.subr.bf16.mxu0 %v1574_v1 }
  0x4b   :  { %1250 = vmatpush3.bf16.msra.mxu1 %v1401_v14 }
  0x4c   :  { %1251 = vmatprep.subr.bf16.mxu1 %v1574_v1  ;;  %1276 = vmatpush3.bf16.msra.mxu0 %v1412_v25 }
  0x4d   :  { %1277 = vmatprep.subr.bf16.mxu0 %v1574_v1 }
  0x4f   :  { %1252 = vmatpush3.bf16.msra.mxu1 %v1402_v15 }
  0x50   :  { %1253 = vmatprep.subr.bf16.mxu1 %v1574_v1  ;;  %1278 = vmatpush3.bf16.msra.mxu0 %v1413_v35  ;;  %v1425_v35 = vld [vmem:[%s1900_s4 + $0x78] sm:$0xff]  }
  0x51   :  { %1279 = vmatprep.subr.bf16.mxu0 %v1574_v1 }
  0x53   :  { %1254 = vmatpush3.bf16.msra.mxu1 %v1403_v16 }
  0x54   :  { %1255 = vmatprep.subr.bf16.mxu1 %v1574_v1  ;;  %1280 = vmatpush3.bf16.msra.mxu0 %v1414_v36 }
  0x55   :  { %1281 = vmatprep.subr.bf16.mxu0 %v1574_v1 }
  0x57   :  { %1256 = vmatpush3.bf16.msra.mxu1 %v1404_v17 }
  0x58   :  { %1257 = vmatprep.subr.bf16.mxu1 %v1574_v1  ;;  %1282 = vmatpush3.bf16.msra.mxu0 %v1415_v37  ;;  %v1426_v37 = vld [vmem:[%s1900_s4 + $0x70] sm:$0xff]  }
  0x59   :  { %1307 = vmatprep.subr.bf16.mxu0 %v1574_v1 }
  0x5b   :  { %1258 = vmatpush3.bf16.msra.mxu1 %v1405_v18 }
  0x5c   :  { %1259 = vmatprep.subr.bf16.mxu1 %v1574_v1 }
  0x5f   :  { %1260 = vmatpush3.bf16.msra.mxu1 %v1406_v19 }
  0x60   :  { %1261 = vmatprep.subr.bf16.mxu1 %v1574_v1 }
  0x63   :  { %1262 = vmatpush3.bf16.msra.mxu1 %v1407_v20 }
  0x64   :  { %1287 = vmatprep.subr.bf16.mxu1 %v1574_v1 }
  0xb4   :  { %v562_v24 = vpop.permute.xlu0 %561 }
 0x106   :  { %v184_v26 = vpop.f32.mrf.mxu1 }
 0x107   :  { %v200_v29 = vadd.f32 %v1091_v27, %v184_v26 }
 0x108   :  { %v1704_v28 = vpop.f32.mrf.mxu1 }
 0x109   :  { %v202_v32 = vmax.f32 %v200_v29, 0.0 }
 0x10a   :  { %v188_v30 = vpop.f32.mrf.mxu1 }
 0x10b   :  { %v201_v31 = vadd.f32 %v1091_v27, %v188_v30  ;;  %v564_v27 = vpop.permute.xlu0 %563 }
 0x10c   :  { %v1731_v43 = vpop.f32.mrf.mxu1 }
 0x10d   :  { %v203_v33 = vmax.f32 %v201_v31, 0.0 }
 0x10f   :  { %v204_v34 = vpack.c.bf16 %v203_v33, %v202_v32 }
 0x111   :  { %1264 = vmatmul.mubr.bf16.vlgmr.msra.gmra.mxu1 %v204_v34 }
 0x112   :  { %1303 = vmatprep.mubr.msk.bf16.mxu1 %vm1575_vm1, %v1574_v1  ;;  %1288 = vmatpush3.bf16.msra.mxu1 %v1416_v38  ;;  %v1427_v38 = vld [vmem:[%s1900_s4 + $0x68] sm:$0xff]  }
 0x113   :  { %1289 = vmatprep.subr.bf16.mxu1 %v1574_v1 }
 0x116   :  { %1290 = vmatpush3.bf16.msra.mxu1 %v1417_v39  ;;  %v1428_v39 = vld [vmem:[%s1900_s4 + $0x60] sm:$0xff]  }
 0x117   :  { %1291 = vmatprep.subr.bf16.mxu1 %v1574_v1 }
 0x11a   :  { %1292 = vmatpush3.bf16.msra.mxu1 %v1418_v40  ;;  %v1429_v40 = vld [vmem:[%s1900_s4 + $0x58] sm:$0xff]  }
 0x11b   :  { %1293 = vmatprep.subr.bf16.mxu1 %v1574_v1 }
 0x11e   :  { %1294 = vmatpush3.bf16.msra.mxu1 %v1419_v41  ;;  %v1430_v41 = vld [vmem:[%s1900_s4 + $0x50] sm:$0xff]  }
 0x11f   :  { %1295 = vmatprep.subr.bf16.mxu1 %v1574_v1 }
 0x122   :  { %1296 = vmatpush3.bf16.msra.mxu1 %v1420_v42  ;;  %v1431_v42 = vld [vmem:[%s1900_s4 + $0x48] sm:$0xff]  }
 0x123   :  { %1297 = vmatprep.subr.bf16.mxu1 %v1574_v1 }
 0x126   :  { %1298 = vmatpush3.bf16.msra.mxu1 %v1421_v54 }
 0x127   :  { %1299 = vmatprep.subr.bf16.mxu1 %v1574_v1 }
 0x12a   :  { %1300 = vmatpush3.bf16.msra.mxu1 %v1422_v55 }
 0x12b   :  { %1301 = vmatprep.subr.bf16.mxu1 %v1574_v1 }
 0x12e   :  { %1302 = vmatpush3.bf16.msra.mxu1 %v1423_v56 }
 0x12f   :  { %1333 = vmatprep.subr.bf16.mxu1 %v1574_v1 }
 0x1d1   :  { %v310_v45 = vpop.f32.mrf.mxu1 }
 0x1d2   :  { %v311_v47 = vadd.f32 %v1092_v44, %v310_v45  ;;  %v1433_v45 = vld [vmem:[#allocation8 + $0x78] sm:$0xff]  }
 0x1d3   :  { %v1265_v46 = vpop.f32.mrf.mxu1 }
 0x1d4   :  { %v317_v51 = vmax.f32 %v311_v47, 0.0  ;;  %v1434_v46 = vld [vmem:[#allocation8 + $0x70] sm:$0xff]   ;;  %v1435_v47 = vld [vmem:[#allocation8 + $0x68] sm:$0xff]  }
 0x1d5   :  { %v313_v48 = vpop.f32.mrf.mxu1 }
 0x1d6   :  { %v314_v49 = vadd.f32 %v1092_v44, %v313_v48  ;;  %v1432_v44 = vld [vmem:[%s1900_s4 + $0x40] sm:$0xff]   ;;  %v1436_v48 = vld [vmem:[#allocation8 + $0x60] sm:$0xff]  }
 0x1d7   :  { %v1266_v50 = vpop.f32.mrf.mxu1 }
 0x1d8   :  { %v318_v52 = vmax.f32 %v314_v49, 0.0  ;;  %v1437_v49 = vld [vmem:[#allocation8 + $0x58] sm:$0xff]   ;;  %v1122_v50 = vld [vmem:[%s1899_s3 + $0x1] ss:$0 sm:$0xff] }
 0x1d9   :  { %v608_v54 = vadd.f32 %v1122_v50, %v1731_v43  ;;  %v1441_v43 = vld [vmem:[%s1904_s8 + $0x78] sm:$0xff]  }
 0x1da   :  { %v319_v53 = vpack.c.bf16 %v318_v52, %v317_v51  ;;  %v607_v52 = vadd.f32 %v1122_v50, %v1704_v28  ;;  %v1440_v28 = vld [vmem:[#allocation8 + $0x40] sm:$0xff]  }
 0x1dc   :  { %1284 = vmatmul.mubr.bf16.vlgmr.msra.gmra.mxu0 %v319_v53 }
 0x1dd   :  { %1309 = vmatprep.mubr.msk.bf16.mxu0 %vm1575_vm1, %v1574_v1  ;;  %1308 = vmatpush3.bf16.msra.mxu0 %v1424_v23 }
 0x1de   :  { %1313 = vmatprep.subr.bf16.mxu0 %v1574_v1 }
 0x29c   :  { %v425_v60 = vpop.f32.mrf.mxu0 }
 0x29d   :  { %v426_v62 = vadd.f32 %v1101_v59, %v425_v60 }
 0x29e   :  { %v1285_v61 = vpop.f32.mrf.mxu0 }
 0x29f   :  { %v432_v3 = vmax.f32 %v426_v62, 0.0  ;;  %v1438_v62 = vld [vmem:[#allocation8 + $0x50] sm:$0xff]  }
 0x2a0   :  { %v428_v63 = vpop.f32.mrf.mxu0 }
 0x2a1   :  { %v429_v0 = vadd.f32 %v1101_v59, %v428_v63  ;;  %v1439_v63 = vld [vmem:[#allocation8 + $0x48] sm:$0xff]  }
 0x2a2   :  { %v1286_v2 = vpop.f32.mrf.mxu0 }
 0x2a3   :  { %v433_v4 = vmax.f32 %v429_v0, 0.0  ;;  %v1442_v0 = vld [vmem:[%s1904_s8 + $0x70] sm:$0xff]   ;;  %v1443_v2 = vld [vmem:[%s1904_s8 + $0x68] sm:$0xff]  }
 0x2a5   :  { %v434_v5 = vpack.c.bf16 %v433_v4, %v432_v3  ;;  %v1444_v3 = vld [vmem:[%s1904_s8 + $0x60] sm:$0xff]   ;;  %v1445_v4 = vld [vmem:[%s1904_s8 + $0x58] sm:$0xff]  }
 0x2a7   :  { %1304 = vmatmul.mubr.bf16.vlgmr.msra.gmra.mxu1 %v434_v5  ;;  %v1142_v5 = vld [vmem:[%s1901_s5 + $0x1] ss:$0 sm:$0xff] }
 0x2a8   :  { %1349 = vmatprep.mubr.msk.bf16.mxu1 %vm1575_vm1, %v1574_v1  ;;  %1334 = vmatpush3.bf16.msra.mxu1 %v1433_v45 }
 0x2a9   :  { %1335 = vmatprep.subr.bf16.mxu1 %v1574_v1 }
 0x2ac   :  { %1336 = vmatpush3.bf16.msra.mxu1 %v1434_v46 }
 0x2ad   :  { %1337 = vmatprep.subr.bf16.mxu1 %v1574_v1 }
 0x2b0   :  { %1338 = vmatpush3.bf16.msra.mxu1 %v1435_v47 }
 0x2b1   :  { %1339 = vmatprep.subr.bf16.mxu1 %v1574_v1 }
 0x2b4   :  { %1340 = vmatpush3.bf16.msra.mxu1 %v1436_v48 }
 0x2b5   :  { %1341 = vmatprep.subr.bf16.mxu1 %v1574_v1 }
 0x2b8   :  { %1342 = vmatpush3.bf16.msra.mxu1 %v1437_v49 }
 0x2b9   :  { %1343 = vmatprep.subr.bf16.mxu1 %v1574_v1 }
 0x2bc   :  { %1344 = vmatpush3.bf16.msra.mxu1 %v1438_v62 }
 0x2bd   :  { %1345 = vmatprep.subr.bf16.mxu1 %v1574_v1 }
 0x2c0   :  { %1346 = vmatpush3.bf16.msra.mxu1 %v1439_v63 }
 0x2c1   :  { %1347 = vmatprep.subr.bf16.mxu1 %v1574_v1 }
 0x2c4   :  { %1348 = vmatpush3.bf16.msra.mxu1 %v1440_v28 }
 0x367   :  { %v540_v9 = vpop.f32.mrf.mxu1 }
 0x368   :  { %v541_v10 = vadd.f32 %v1110_v7, %v540_v9 }
 0x369   :  { %v1305_v11 = vpop.f32.mrf.mxu1 }
 0x36a   :  { %v1119_v12 = vclamps-f32 %v541_v10, 10.0 }
 0x36b   :  { %v543_v13 = vpop.f32.mrf.mxu1 }
 0x36c   :  { %v551_v14 = vmul.f32 0.5, %v1119_v12  ;;  %v582_v15 = vsel %vm581_vm2, %v1119_v12, %v541_v10  ;;  %v544_v16 = vadd.f32 %v1110_v7, %v543_v13 }
 0x36d   :  { %585 = vst.msk [vmem:[#allocation10] sm:$0xff] %vm584_vm3, %v582_v15  ;;  %v1306_v17 = vpop.f32.mrf.mxu1 }
 0x36e   :  { %v553_v18 = vmul.f32 1.442695, %v551_v14  ;;  %v1120_v19 = vclamps-f32 %v544_v16, 10.0  ;;  %v1447_v17 = vld [vmem:[%s1904_s8 + $0x48] sm:$0xff]  }
 0x370   :  { %1449 = vpow2.f32 %v553_v18  ;;  %v552_v20 = vmul.f32 0.5, %v1120_v19  ;;  %v583_v21 = vsel %vm581_vm2, %v1120_v19, %v544_v16  ;;  %v1448_v18 = vld [vmem:[%s1904_s8 + $0x40] sm:$0xff]   ;;  %v1189_v19 = vld [vmem:[%s1906_s10 + $0x10] sm:$0xff] }
 0x371   :  { %586 = vst.msk [vmem:[#allocation10 + $0x8] sm:$0xff] %vm584_vm3, %v583_v21  ;;  %1030 = vrot.lane.b32.xlu0 %v1189_v19, %s1576_s17 }
 0x372   :  { %v555_v22 = vmul.f32 1.442695, %v552_v20  ;;  %v1190_v20 = vld [vmem:[%s1906_s10 + $0x18] sm:$0xff] }
 0x374   :  { %1451 = vpow2.f32 %v555_v22 }
 0x37d   :  { %v1450_v25 = vpop.eup %1449 }
 0x37e   :  { %v567_v26 = vmul.f32 %v1450_v25, %v562_v24 }
 0x380   :  { %571 = vrot.lane.b32.xlu1 %v567_v26, %s1577_s21 }
 0x381   :  { %v1452_v29 = vpop.eup %1451 }
 0x382   :  { %v568_v30 = vmul.f32 %v1452_v29, %v564_v27 }
 0x384   :  { %573 = vrot.lane.b32.xlu1 %v568_v30, %s1577_s21 }
 0x388   :  { %1032 = vrot.lane.b32.xlu1 %v1190_v20, %s1576_s17 }
 0x3e3   :  { %v1031_v49 = vpop.permute.xlu0 %1030 }
 0x3f2   :  { %v572_v31 = vpop.permute.xlu1 %571 }
 0x3f3   :  { %v1778_v33 = vadd.f32 %v572_v31, %v541_v10  ;;  %v1178_v31 = vld [vmem:[%s1905_s9 + $0x1] ss:$0 sm:$0xff]  ;;  %s1579_s9 = smov [#allocation10]  }
 0x3f4   :  { %s1068_s17 = sshll.u32 %s1579_s9, 4  ;;  %s1069_s17 = int_to_ptr.vmem [resolvable:$true] %s1068_s17 }
 0x3f5   :  { %p1542_p7 = scmp.lt.s32.totalorder %s1069_s17, %s1069_s17 }
 0x3f6   :  { %v574_v32 = vpop.permute.xlu1 %573 }
 0x3f7   :  { %v1780_v34 = vadd.f32 %v574_v32, %v544_v16  ;;  %v1446_v16 = vld [vmem:[%s1904_s8 + $0x50] sm:$0xff]  }
 0x3f9   :  { %v598_v36 = vpack.c.bf16 %v1780_v34, %v1778_v33 }
 0x3fb   :  { %1310 = vmatmul.mubr.msk.bf16.vlgmr.msra.gmra.mxu0 %vm617_vm4, %v598_v36 }
 0x3fc   :  { %1314 = vmatpush3.bf16.msra.mxu0 %v1425_v35  ;;  %1329 = vmatprep.mubr.msk.bf16.mxu0 %vm1575_vm1, %v1574_v1 }
 0x3fd   :  { %1315 = vmatprep.subr.bf16.mxu0 %v1574_v1 }
 0x400   :  { %1316 = vmatpush3.bf16.msra.mxu0 %v1426_v37 }
 0x401   :  { %1317 = vmatprep.subr.bf16.mxu0 %v1574_v1 }
 0x404   :  { %1318 = vmatpush3.bf16.msra.mxu0 %v1427_v38 }
 0x405   :  { %1319 = vmatprep.subr.bf16.mxu0 %v1574_v1 }
 0x408   :  { %1320 = vmatpush3.bf16.msra.mxu0 %v1428_v39 }
 0x409   :  { %1321 = vmatprep.subr.bf16.mxu0 %v1574_v1 }
 0x40c   :  { %1322 = vmatpush3.bf16.msra.mxu0 %v1429_v40 }
 0x40d   :  { %1323 = vmatprep.subr.bf16.mxu0 %v1574_v1 }
 0x410   :  { %1324 = vmatpush3.bf16.msra.mxu0 %v1430_v41 }
 0x411   :  { %1325 = vmatprep.subr.bf16.mxu0 %v1574_v1 }
 0x414   :  { %1326 = vmatpush3.bf16.msra.mxu0 %v1431_v42 }
 0x415   :  { %1327 = vmatprep.subr.bf16.mxu0 %v1574_v1 }
 0x418   :  { %1328 = vmatpush3.bf16.msra.mxu0 %v1432_v44 }
 0x419   :  { %1353 = vmatprep.subr.bf16.mxu0 %v1574_v1 }
 0x4bb   :  { %v655_v51 = vpop.f32.mrf.mxu0 }
 0x4bc   :  { %v662_v55 = vadd.f32 %v655_v51, %v607_v52  ;;  %v1033_v52 = vpop.permute.xlu1 %1032 }
 0x4bd   :  { %v1311_v53 = vpop.f32.mrf.mxu0 }
 0x4be   :  { %v664_v59 = vmax.f32 %v662_v55, 0.0 }
 0x4bf   :  { %v658_v56 = vpop.f32.mrf.mxu0 }
 0x4c0   :  { %v663_v57 = vadd.f32 %v658_v56, %v608_v54 }
 0x4c1   :  { %v1312_v58 = vpop.f32.mrf.mxu0 }
 0x4c2   :  { %v665_v60 = vmax.f32 %v663_v57, 0.0 }
 0x4c4   :  { %v666_v61 = vpack.c.bf16 %v665_v60, %v664_v59 }
 0x4c6   :  { %1330 = vmatmul.mubr.bf16.vlgmr.msra.gmra.mxu0 %v666_v61 }
 0x4c7   :  { %1369 = vmatprep.mubr.msk.bf16.mxu0 %vm1575_vm1, %v1574_v1  ;;  %1354 = vmatpush3.bf16.msra.mxu0 %v1441_v43 }
 0x4c8   :  { %1355 = vmatprep.subr.bf16.mxu0 %v1574_v1 }
 0x4cb   :  { %1356 = vmatpush3.bf16.msra.mxu0 %v1442_v0 }
 0x4cc   :  { %1357 = vmatprep.subr.bf16.mxu0 %v1574_v1 }
 0x4cf   :  { %1358 = vmatpush3.bf16.msra.mxu0 %v1443_v2 }
 0x4d0   :  { %1359 = vmatprep.subr.bf16.mxu0 %v1574_v1 }
 0x4d3   :  { %1360 = vmatpush3.bf16.msra.mxu0 %v1444_v3 }
 0x4d4   :  { %1361 = vmatprep.subr.bf16.mxu0 %v1574_v1 }
 0x4d7   :  { %1362 = vmatpush3.bf16.msra.mxu0 %v1445_v4 }
 0x4d8   :  { %1363 = vmatprep.subr.bf16.mxu0 %v1574_v1 }
 0x4db   :  { %1364 = vmatpush3.bf16.msra.mxu0 %v1446_v16 }
 0x4dc   :  { %1365 = vmatprep.subr.bf16.mxu0 %v1574_v1 }
 0x4df   :  { %1366 = vmatpush3.bf16.msra.mxu0 %v1447_v17 }
 0x4e0   :  { %1367 = vmatprep.subr.bf16.mxu0 %v1574_v1  ;;  %v1152_v1 = vld [vmem:[%s1903_s7 + $0x1] ss:$0 sm:$0xff]  ;;  %s1578_s7 = smov 32  }
 0x4e3   :  { %1368 = vmatpush3.bf16.msra.mxu0 %v1448_v18 }
 0x586   :  { %v774_v6 = vpop.f32.mrf.mxu0 }
 0x587   :  { %v775_v9 = vadd.f32 %v1142_v5, %v774_v6 }
 0x588   :  { %v1331_v7 = vpop.f32.mrf.mxu0 }
 0x589   :  { %v781_v13 = vmax.f32 %v775_v9, 0.0 }
 0x58a   :  { %v777_v10 = vpop.f32.mrf.mxu0 }
 0x58b   :  { %v778_v11 = vadd.f32 %v1142_v5, %v777_v10 }
 0x58c   :  { %v1332_v12 = vpop.f32.mrf.mxu0 }
 0x58d   :  { %v782_v14 = vmax.f32 %v778_v11, 0.0 }
 0x58f   :  { %v783_v15 = vpack.c.bf16 %v782_v14, %v781_v13 }
 0x591   :  { %1350 = vmatmul.mubr.bf16.vlgmr.msra.gmra.mxu1 %v783_v15 }
 0x651   :  { %v891_v21 = vpop.f32.mrf.mxu1 }
 0x652   :  { %v892_v23 = vadd.f32 %v1152_v1, %v891_v21 }
 0x653   :  { %v1351_v22 = vpop.f32.mrf.mxu1 }
 0x654   :  { %v898_v27 = vmax.f32 %v892_v23, 0.0 }
 0x655   :  { %v894_v24 = vpop.f32.mrf.mxu1 }
 0x656   :  { %v895_v25 = vadd.f32 %v1152_v1, %v894_v24 }
 0x657   :  { %v1352_v26 = vpop.f32.mrf.mxu1 }
 0x658   :  { %v899_v29 = vmax.f32 %v895_v25, 0.0 }
 0x65a   :  { %v900_v30 = vpack.c.bf16 %v899_v29, %v898_v27 }
 0x65c   :  { %1370 = vmatmul.mubr.bf16.vlgmr.msra.gmra.mxu0 %v900_v30 }
 0x71c   :  { %v1008_v32 = vpop.f32.mrf.mxu0 }
 0x71d   :  { %v1009_v35 = vadd.f32 %v1178_v31, %v1008_v32 }
 0x71e   :  { %v1371_v36 = vpop.f32.mrf.mxu0 }
 0x71f   :  { %v1187_v37 = vclamps-f32 %v1009_v35, 10.0 }
 0x720   :  { %v1011_v38 = vpop.f32.mrf.mxu0 }
 0x721   :  { %v1019_v39 = vmul.f32 0.5, %v1187_v37  ;;  %v1048_v40 = vsel %vm581_vm2, %v1187_v37, %v1009_v35  ;;  %v1012_v41 = vadd.f32 %v1178_v31, %v1011_v38 }
 0x722   :  { %1051 = vst.msk [vmem:[#allocation10 + $0x10] sm:$0xff] %vm584_vm3, %v1048_v40  ;;  %v1372_v42 = vpop.f32.mrf.mxu0 }
 0x723   :  { %v1021_v44 = vmul.f32 1.442695, %v1019_v39  ;;  %v1188_v45 = vclamps-f32 %v1012_v41, 10.0 }
 0x725   :  { %1453 = vpow2.f32 %v1021_v44  ;;  %v1020_v46 = vmul.f32 0.5, %v1188_v45  ;;  %v1049_v47 = vsel %vm581_vm2, %v1188_v45, %v1012_v41 }
 0x726   :  { %1052 = vst.msk [vmem:[#allocation10 + $0x18] sm:$0xff] %vm584_vm3, %v1049_v47 }
 0x727   :  { %v1023_v48 = vmul.f32 1.442695, %v1020_v46 }
 0x729   :  { %1455 = vpow2.f32 %v1023_v48 }
 0x732   :  { %v1454_v50 = vpop.eup %1453 }
 0x733   :  { %v1036_v51 = vmul.f32 %v1454_v50, %v1031_v49 }
 0x735   :  { %1040 = vrot.lane.b32.xlu0 %v1036_v51, %s1577_s21 }
 0x736   :  { %v1456_v53 = vpop.eup %1455 }
 0x737   :  { %v1037_v54 = vmul.f32 %v1456_v53, %v1033_v52 }
 0x739   :  { %589 = vrot.lane.b32.xlu0 %v1778_v33, %s1578_s7  ;;  %1042 = vrot.lane.b32.xlu1 %v1037_v54, %s1577_s21  ;;  %s1537_s21 = scalar_lea.vmem %s1069_s17, 512 }
 0x73a   :  { %p1538_p6 = scmp.ne.s32.totalorder %s1069_s17, %s1537_s21  ;;  %p1543_p8 = scmp.lt.s32.totalorder %s1537_s21, %s1537_s21 }
 0x73c   :  { %p1544_p9 = por %p1543_p8, %p1542_p7 }
 0x73d   :  { %591 = vrot.lane.b32.xlu1 %v1780_v34, %s1578_s7 }
 0x73e   :  { %p1545_p10 = pnand %p1544_p9, %p1538_p6 }
 0x7a7   :  { %v1041_v8 = vpop.permute.xlu0 %1040 }
 0x7a8   :  { %v1046_v55 = vadd.f32 %v1041_v8, %v1009_v35 }
 0x7aa   :  { %1055 = vrot.lane.b32.xlu0 %v1046_v55, %s1578_s7 }
 0x7ab   :  { %v590_v56 = vpop.permute.xlu0 %589  ;;  %v1043_v57 = vpop.permute.xlu1 %1042 }
 0x7ac   :  { %596 = vst.msk [vmem:[#allocation10] sm:$0xff] %vm595_vm5, %v590_v56  ;;  %v1047_v58 = vadd.f32 %v1043_v57, %v1012_v41 }
 0x7ae   :  { %1057 = vrot.lane.b32.xlu1 %v1047_v58, %s1578_s7 }
 0x7af   :  { %v592_v59 = vpop.permute.xlu1 %591 }
 0x7b0   :  { %597 = vst.msk [vmem:[#allocation10 + $0x8] sm:$0xff] %vm595_vm5, %v592_v59 }
 0x81c   :  { %v1056_v60 = vpop.permute.xlu0 %1055 }
 0x81d   :  { %1061 = vst.msk [vmem:[#allocation10 + $0x10] sm:$0xff] %vm595_vm5, %v1056_v60 }
 0x820   :  { %v1058_v33 = vpop.permute.xlu1 %1057 }
 0x821   :  { %1062 = vst.msk [vmem:[#allocation10 + $0x18] sm:$0xff] %vm595_vm5, %v1058_v33 }
 0x822   :  { %1548 = shalt.err (!%p1545_p10)
}
 0x823   :  { %1074 = dma.vmem_to_hbm [thread:$0]  %s1069_s17, 512, %s1907_s11, [#allocation4], %s1567_s22, %s1567_s22, %s1568_s23  }
 0x824   :  { %1563 = dma.done.wait [#allocation4], 512  }
 0x825   :  { %1564 = vsyncadd [#allocation4], 4294966784 }
 0x826   :  { %1078 = vsyncpa [#allocation3], 1 }
 0x827   :  { %1079 = vsyncpa [#allocation6], 1 }
 0x828   :  { %1080 = vsyncpa [#allocation9], 1 }
 0x829   :  { %1081 = vsyncpa [#allocation4], 1 }

</bundles_post_ra>
